<compile_context>
chip_gen: v7x
topology: tpu7x:2x2x1
jax: 0.10.0
libtpu: 0.0.40
codegen_flags: <defaults>
</compile_context>

<pallas_src>
import numpy as np

import jax
import jax.numpy as jnp
from jax.experimental import pallas as pl
from jax.experimental.pallas import tpu as pltpu


# ------------------------- fused conv-block kernel ------------------------- #

def _make_fused_conv_kernel(use_instance_norm: bool, activation: str,
                            add_residual: bool):
    """conv-as-matmul + bias (+IN) (+act) (+residual), one kernel per block.

    Ref shapes (per grid step == per image, spatial M = H*W on the lane axis):
      a_ref: (K, M)      im2col patches (K = C_in * k * k)
      w_ref: (C_out, K)  flattened conv weights
      b_ref: (C_out, 1)  bias
      r_ref: (C_out, M)  optional residual
      o_ref: (C_out, M)
    """
    def kernel(*refs):
        if add_residual:
            a_ref, w_ref, b_ref, r_ref, o_ref = refs
        else:
            a_ref, w_ref, b_ref, o_ref = refs

        # Lane-dense transposed matmul on the MXU: (C_out, K) @ (K, M).
        y = jnp.dot(w_ref[...], a_ref[...], preferred_element_type=jnp.float32)
        y = y + b_ref[...]                                    # (C_out, M)

        if use_instance_norm:
            # Per-(image, channel) stats over the spatial (lane) axis.
            mean = jnp.mean(y, axis=1, keepdims=True)
            var = jnp.mean(jnp.square(y - mean), axis=1, keepdims=True)
            y = (y - mean) * jax.lax.rsqrt(var + 1e-5)

        if activation == "relu":
            y = jnp.maximum(y, 0.0)
        elif activation == "tanh":
            y = jnp.tanh(y)
        # activation == 'none': passthrough

        if add_residual:
            y = y + r_ref[...]

        o_ref[...] = y

    return kernel


# --------------------- static im2col / upsample indexing ------------------- #

def _reflect(x, n):
    """PyTorch-style reflection (edge not repeated) for pad < n."""
    x = np.where(x < 0, -x, x)
    x = np.where(x >= n, 2 * n - 2 - x, x)
    return x


def _conv_gather_indices(H, W, k, pad, up):
    """Flat source indices for im2col of a k x k conv with reflect padding,
    with an optional nearest x`up` upsample folded in (no 4x intermediate).

    Returns int32 array of shape (k*k, (up*H) * (up*W)) indexing into the
    flattened (H*W) source image.
    """
    Ho, Wo = H * up, W * up
    di = np.arange(k).reshape(k, 1, 1, 1)
    dj = np.arange(k).reshape(1, k, 1, 1)
    i = np.arange(Ho).reshape(1, 1, Ho, 1)
    j = np.arange(Wo).reshape(1, 1, 1, Wo)
    rr = _reflect(i + di - pad, Ho)        # row on the (upsampled) padded grid
    cc = _reflect(j + dj - pad, Wo)
    sr = rr // up                          # nearest-upsample source row
    sc = cc // up
    idx = sr * W + sc                      # (k, k, Ho, Wo)
    return idx.reshape(k * k, Ho * Wo).astype(np.int32)


# ------------------------------ conv block --------------------------------- #

def conv_block(x, w, b, *, k, pad, up, norm, act, residual=None):
    """Fused: [nearest x`up` upsample] -> reflect-pad -> conv(k, stride 1)
    -> optional InstanceNorm -> activation -> optional residual add.

    x: (N, C_in, H, W) f32;  w: (C_out, C_in*k*k);  b: (C_out, 1)
    Returns (N, C_out, up*H, up*W) f32.
    """
    N, C_in, H, W = x.shape
    C_out, K = w.shape
    Ho, Wo = H * up, W * up
    M = Ho * Wo

    # Single static-index gather builds the patch matrix (upsample + reflect
    # pad folded into the indices).  XLA glue; heavy math stays in the kernel.
    idx = jnp.asarray(_conv_gather_indices(H, W, k, pad, up))      # (k*k, M)
    a = jnp.take(x.reshape(N, C_in, H * W), idx, axis=2)           # (N, C_in, k*k, M)
    a = a.reshape(N, C_in * k * k, M)                              # (N, K, M)

    kernel = _make_fused_conv_kernel(norm == "in", act, residual is not None)

    in_specs = [
        pl.BlockSpec((None, K, M), lambda n: (n, 0, 0)),     # patches, per image
        pl.BlockSpec((C_out, K), lambda n: (0, 0)),          # weights (shared)
        pl.BlockSpec((C_out, 1), lambda n: (0, 0)),          # bias (shared)
    ]
    inputs = [a, w, b]
    if residual is not None:
        r = residual.reshape(N, C_out, M)
        in_specs.append(pl.BlockSpec((None, C_out, M), lambda n: (n, 0, 0)))
        inputs.append(r)

    y = pl.pallas_call(
        kernel,
        out_shape=jax.ShapeDtypeStruct((N, C_out, M), jnp.float32),
        grid=(N,),
        in_specs=in_specs,
        out_specs=pl.BlockSpec((None, C_out, M), lambda n: (n, 0, 0)),
        compiler_params=pltpu.CompilerParams(
            dimension_semantics=("parallel",)),   # 2-TC sharding on v7x
    )(*inputs)

    return y.reshape(N, C_out, Ho, Wo)


# ----------------------------- parameter init ------------------------------ #

def _conv_params(key, k, cin, cout, scale=0.05):
    kw_, kb_ = jax.random.split(key)
    w = scale * jax.random.normal(kw_, (cout, cin, k, k), jnp.float32)
    b = scale * jax.random.normal(kb_, (cout, 1), jnp.float32)
    return w.reshape(cout, cin * k * k), b


def init_decoder_params(key, ups, n_res, dim, out_dim):
    params = {"res": [], "ups": [], "final": None}
    d = dim
    for _ in range(n_res):
        key, k1, k2 = jax.random.split(key, 3)
        params["res"].append((*_conv_params(k1, 3, d, d),
                              *_conv_params(k2, 3, d, d)))
    for _ in range(ups):
        key, k1 = jax.random.split(key)
        params["ups"].append(_conv_params(k1, 5, d, d // 2))
        d //= 2
    key, k1 = jax.random.split(key)
    params["final"] = _conv_params(k1, 7, d, out_dim)
    return params


# ------------------------------ decoder fwd -------------------------------- #

@jax.jit
def decoder_forward(x_nchw, params):
    x = x_nchw.astype(jnp.float32)                 # NCHW kept throughout

    # ResBlocks (res_norm='in', activ='relu'); residual fused into 2nd conv.
    for (w1, b1, w2, b2) in params["res"]:
        h = conv_block(x, w1, b1, k=3, pad=1, up=1, norm="in", act="relu")
        x = conv_block(h, w2, b2, k=3, pad=1, up=1, norm="in", act="none",
                       residual=x)

    # Upsample(x2 nearest) fused into the 5x5 Conv2dBlock (dim -> dim//2).
    for (w, b) in params["ups"]:
        x = conv_block(x, w, b, k=5, pad=2, up=2, norm="in", act="relu")

    # Final Conv2dBlock(dim -> out_dim, 7x7, pad 3, norm='none', act='tanh').
    w, b = params["final"]
    x = conv_block(x, w, b, k=7, pad=3, up=1, norm="none", act="tanh")

    return x                                        # NCHW


# --------------------------------- main ------------------------------------ #

if __name__ == "__main__":
    UPS, N_RES, DIM, OUT_DIM = 1, 1, 8, 3
    N, H, W = 2, 8, 8

    key = jax.random.PRNGKey(0)
    kx, kp = jax.random.split(key)
    x = jax.random.normal(kx, (N, DIM, H, W), jnp.float32)   # NCHW like PyTorch
    params = init_decoder_params(kp, UPS, N_RES, DIM, OUT_DIM)

    out = decoder_forward(x, params)
    out = jax.block_until_ready(out)

    expected_shape = (N, OUT_DIM, H * (2 ** UPS), W * (2 ** UPS))
    assert out.shape == expected_shape, (out.shape, expected_shape)
    assert bool(jnp.all(jnp.isfinite(out)))
    assert bool(jnp.all(jnp.abs(out) <= 1.0))  # tanh output range
    print("KERNEL_OK")
</pallas_src>

<mosaic_0001>
module attributes {stable_mosaic.version = 11 : i64} {
  func.func @kernel(%arg0: i32, %arg1: memref<1x72x64xf32, #tpu.memory_space<vmem>>, %arg2: memref<8x72xf32, #tpu.memory_space<vmem>>, %arg3: memref<8x1xf32, #tpu.memory_space<vmem>>, %arg4: memref<1x8x64xf32, #tpu.memory_space<vmem>>) attributes {dimension_semantics = [#tpu.dimension_semantics<parallel>], iteration_bounds = array<i64: 2>, scalar_prefetch = 0 : i64, scratch_operands = 0 : i64, tpu.core_type = #tpu.core_type<tc>, window_params = [{transform_indices = @transform_0, window_bounds = array<i64: 1, 72, 64>}, {pipeline_mode = #tpu.pipeline_mode<synchronous>, transform_indices = @transform_1, window_bounds = array<i64: 8, 72>}, {pipeline_mode = #tpu.pipeline_mode<synchronous>, transform_indices = @transform_2, window_bounds = array<i64: 8, 1>}, {transform_indices = @transform_3, window_bounds = array<i64: 1, 8, 64>}]} {
    %c0 = arith.constant 0 : index
    %c0_0 = arith.constant 0 : index
    %0 = vector.load %arg2[%c0, %c0_0] : memref<8x72xf32, #tpu.memory_space<vmem>>, vector<8x72xf32>
    %c0_1 = arith.constant 0 : index
    %c0_2 = arith.constant 0 : index
    %c0_3 = arith.constant 0 : index
    %1 = vector.load %arg1[%c0_1, %c0_2, %c0_3] : memref<1x72x64xf32, #tpu.memory_space<vmem>>, vector<1x72x64xf32>
    %2 = vector.shape_cast %1 : vector<1x72x64xf32> to vector<72x64xf32>
    %cst = arith.constant dense<0.000000e+00> : vector<8x64xf32>
    %3 = tpu.matmul %0, %2, %cst {dimension_numbers = #tpu.dot_dimension_numbers<[1], [0], [0], [1], [0, 0, 1, 1], [], []>} : vector<8x72xf32>, vector<72x64xf32>, vector<8x64xf32> -> vector<8x64xf32>
    %c0_4 = arith.constant 0 : index
    %c0_5 = arith.constant 0 : index
    %4 = vector.load %arg3[%c0_4, %c0_5] : memref<8x1xf32, #tpu.memory_space<vmem>>, vector<8x1xf32>
    %5 = vector.broadcast %4 : vector<8x1xf32> to vector<8x64xf32>
    %6 = arith.addf %3, %5 : vector<8x64xf32>
    %cst_6 = arith.constant dense<0.000000e+00> : vector<8xf32>
    %7 = vector.multi_reduction <add>, %6, %cst_6 [1] : vector<8x64xf32> to vector<8xf32>
    %8 = vector.shape_cast %7 : vector<8xf32> to vector<8x1xf32>
    %cst_7 = arith.constant 6.400000e+01 : f32
    %9 = vector.broadcast %cst_7 : f32 to vector<8x1xf32>
    %10 = arith.divf %8, %9 : vector<8x1xf32>
    %11 = vector.broadcast %10 : vector<8x1xf32> to vector<8x64xf32>
    %12 = arith.subf %6, %11 : vector<8x64xf32>
    %13 = arith.mulf %12, %12 : vector<8x64xf32>
    %cst_8 = arith.constant dense<0.000000e+00> : vector<8xf32>
    %14 = vector.multi_reduction <add>, %13, %cst_8 [1] : vector<8x64xf32> to vector<8xf32>
    %15 = vector.shape_cast %14 : vector<8xf32> to vector<8x1xf32>
    %cst_9 = arith.constant 6.400000e+01 : f32
    %16 = vector.broadcast %cst_9 : f32 to vector<8x1xf32>
    %17 = arith.divf %15, %16 : vector<8x1xf32>
    %18 = vector.broadcast %10 : vector<8x1xf32> to vector<8x64xf32>
    %19 = arith.subf %6, %18 : vector<8x64xf32>
    %cst_10 = arith.constant 9.99999974E-6 : f32
    %20 = vector.broadcast %cst_10 : f32 to vector<8x1xf32>
    %21 = arith.addf %17, %20 : vector<8x1xf32>
    %22 = math.rsqrt %21 : vector<8x1xf32>
    %23 = vector.broadcast %22 : vector<8x1xf32> to vector<8x64xf32>
    %24 = arith.mulf %19, %23 : vector<8x64xf32>
    %cst_11 = arith.constant 0.000000e+00 : f32
    %25 = vector.broadcast %cst_11 : f32 to vector<8x64xf32>
    %26 = arith.maximumf %24, %25 : vector<8x64xf32>
    %c0_12 = arith.constant 0 : index
    %c0_13 = arith.constant 0 : index
    %c0_14 = arith.constant 0 : index
    %27 = vector.load %arg4[%c0_12, %c0_13, %c0_14] : memref<1x8x64xf32, #tpu.memory_space<vmem>>, vector<1x8x64xf32>
    %28 = vector.shape_cast %27 : vector<1x8x64xf32> to vector<8x64xf32>
    %29 = vector.shape_cast %26 : vector<8x64xf32> to vector<1x8x64xf32>
    tpu.vector_store %arg4[%c0_12, %c0_13, %c0_14], %29 {strides = array<i32>} : memref<1x8x64xf32, #tpu.memory_space<vmem>>, vector<1x8x64xf32>,
    return
  }
  func.func @transform_0(%arg0: i32) -> (i32, i32, i32) {
    %c0_i32 = arith.constant 0 : i32
    %c0_i32_0 = arith.constant 0 : i32
    %c0_i32_1 = arith.constant 0 : i32
    return %arg0, %c0_i32, %c0_i32_0 : i32, i32, i32
  }
  func.func @transform_1(%arg0: i32) -> (i32, i32) {
    %c0_i32 = arith.constant 0 : i32
    %c0_i32_0 = arith.constant 0 : i32
    %c0_i32_1 = arith.constant 0 : i32
    return %c0_i32, %c0_i32_0 : i32, i32
  }
  func.func @transform_2(%arg0: i32) -> (i32, i32) {
    %c0_i32 = arith.constant 0 : i32
    %c0_i32_0 = arith.constant 0 : i32
    %c0_i32_1 = arith.constant 0 : i32
    return %c0_i32, %c0_i32_0 : i32, i32
  }
  func.func @transform_3(%arg0: i32) -> (i32, i32, i32) {
    %c0_i32 = arith.constant 0 : i32
    %c0_i32_0 = arith.constant 0 : i32
    %c0_i32_1 = arith.constant 0 : i32
    return %arg0, %c0_i32, %c0_i32_0 : i32, i32, i32
  }
}

module attributes {stable_mosaic.version = 11 : i64} {
  func.func @kernel(%arg0: i32, %arg1: memref<1x72x64xf32, #tpu.memory_space<vmem>>, %arg2: memref<8x72xf32, #tpu.memory_space<vmem>>, %arg3: memref<8x1xf32, #tpu.memory_space<vmem>>, %arg4: memref<1x8x64xf32, #tpu.memory_space<vmem>>, %arg5: memref<1x8x64xf32, #tpu.memory_space<vmem>>) attributes {dimension_semantics = [#tpu.dimension_semantics<parallel>], iteration_bounds = array<i64: 2>, scalar_prefetch = 0 : i64, scratch_operands = 0 : i64, tpu.core_type = #tpu.core_type<tc>, window_params = [{transform_indices = @transform_0, window_bounds = array<i64: 1, 72, 64>}, {pipeline_mode = #tpu.pipeline_mode<synchronous>, transform_indices = @transform_1, window_bounds = array<i64: 8, 72>}, {pipeline_mode = #tpu.pipeline_mode<synchronous>, transform_indices = @transform_2, window_bounds = array<i64: 8, 1>}, {transform_indices = @transform_3, window_bounds = array<i64: 1, 8, 64>}, {transform_indices = @transform_4, window_bounds = array<i64: 1, 8, 64>}]} {
    %c0 = arith.constant 0 : index
    %c0_0 = arith.constant 0 : index
    %0 = vector.load %arg2[%c0, %c0_0] : memref<8x72xf32, #tpu.memory_space<vmem>>, vector<8x72xf32>
    %c0_1 = arith.constant 0 : index
    %c0_2 = arith.constant 0 : index
    %c0_3 = arith.constant 0 : index
    %1 = vector.load %arg1[%c0_1, %c0_2, %c0_3] : memref<1x72x64xf32, #tpu.memory_space<vmem>>, vector<1x72x64xf32>
    %2 = vector.shape_cast %1 : vector<1x72x64xf32> to vector<72x64xf32>
    %cst = arith.constant dense<0.000000e+00> : vector<8x64xf32>
    %3 = tpu.matmul %0, %2, %cst {dimension_numbers = #tpu.dot_dimension_numbers<[1], [0], [0], [1], [0, 0, 1, 1], [], []>} : vector<8x72xf32>, vector<72x64xf32>, vector<8x64xf32> -> vector<8x64xf32>
    %c0_4 = arith.constant 0 : index
    %c0_5 = arith.constant 0 : index
    %4 = vector.load %arg3[%c0_4, %c0_5] : memref<8x1xf32, #tpu.memory_space<vmem>>, vector<8x1xf32>
    %5 = vector.broadcast %4 : vector<8x1xf32> to vector<8x64xf32>
    %6 = arith.addf %3, %5 : vector<8x64xf32>
    %cst_6 = arith.constant dense<0.000000e+00> : vector<8xf32>
    %7 = vector.multi_reduction <add>, %6, %cst_6 [1] : vector<8x64xf32> to vector<8xf32>
    %8 = vector.shape_cast %7 : vector<8xf32> to vector<8x1xf32>
    %cst_7 = arith.constant 6.400000e+01 : f32
    %9 = vector.broadcast %cst_7 : f32 to vector<8x1xf32>
    %10 = arith.divf %8, %9 : vector<8x1xf32>
    %11 = vector.broadcast %10 : vector<8x1xf32> to vector<8x64xf32>
    %12 = arith.subf %6, %11 : vector<8x64xf32>
    %13 = arith.mulf %12, %12 : vector<8x64xf32>
    %cst_8 = arith.constant dense<0.000000e+00> : vector<8xf32>
    %14 = vector.multi_reduction <add>, %13, %cst_8 [1] : vector<8x64xf32> to vector<8xf32>
    %15 = vector.shape_cast %14 : vector<8xf32> to vector<8x1xf32>
    %cst_9 = arith.constant 6.400000e+01 : f32
    %16 = vector.broadcast %cst_9 : f32 to vector<8x1xf32>
    %17 = arith.divf %15, %16 : vector<8x1xf32>
    %18 = vector.broadcast %10 : vector<8x1xf32> to vector<8x64xf32>
    %19 = arith.subf %6, %18 : vector<8x64xf32>
    %cst_10 = arith.constant 9.99999974E-6 : f32
    %20 = vector.broadcast %cst_10 : f32 to vector<8x1xf32>
    %21 = arith.addf %17, %20 : vector<8x1xf32>
    %22 = math.rsqrt %21 : vector<8x1xf32>
    %23 = vector.broadcast %22 : vector<8x1xf32> to vector<8x64xf32>
    %24 = arith.mulf %19, %23 : vector<8x64xf32>
    %c0_11 = arith.constant 0 : index
    %c0_12 = arith.constant 0 : index
    %c0_13 = arith.constant 0 : index
    %25 = vector.load %arg4[%c0_11, %c0_12, %c0_13] : memref<1x8x64xf32, #tpu.memory_space<vmem>>, vector<1x8x64xf32>
    %26 = vector.shape_cast %25 : vector<1x8x64xf32> to vector<8x64xf32>
    %27 = arith.addf %24, %26 : vector<8x64xf32>
    %c0_14 = arith.constant 0 : index
    %c0_15 = arith.constant 0 : index
    %c0_16 = arith.constant 0 : index
    %28 = vector.load %arg5[%c0_14, %c0_15, %c0_16] : memref<1x8x64xf32, #tpu.memory_space<vmem>>, vector<1x8x64xf32>
    %29 = vector.shape_cast %28 : vector<1x8x64xf32> to vector<8x64xf32>
    %30 = vector.shape_cast %27 : vector<8x64xf32> to vector<1x8x64xf32>
    tpu.vector_store %arg5[%c0_14, %c0_15, %c0_16], %30 {strides = array<i32>} : memref<1x8x64xf32, #tpu.memory_space<vmem>>, vector<1x8x64xf32>,
    return
  }
  func.func @transform_0(%arg0: i32) -> (i32, i32, i32) {
    %c0_i32 = arith.constant 0 : i32
    %c0_i32_0 = arith.constant 0 : i32
    %c0_i32_1 = arith.constant 0 : i32
    return %arg0, %c0_i32, %c0_i32_0 : i32, i32, i32
  }
  func.func @transform_1(%arg0: i32) -> (i32, i32) {
    %c0_i32 = arith.constant 0 : i32
    %c0_i32_0 = arith.constant 0 : i32
    %c0_i32_1 = arith.constant 0 : i32
    return %c0_i32, %c0_i32_0 : i32, i32
  }
  func.func @transform_2(%arg0: i32) -> (i32, i32) {
    %c0_i32 = arith.constant 0 : i32
    %c0_i32_0 = arith.constant 0 : i32
    %c0_i32_1 = arith.constant 0 : i32
    return %c0_i32, %c0_i32_0 : i32, i32
  }
  func.func @transform_3(%arg0: i32) -> (i32, i32, i32) {
    %c0_i32 = arith.constant 0 : i32
    %c0_i32_0 = arith.constant 0 : i32
    %c0_i32_1 = arith.constant 0 : i32
    return %arg0, %c0_i32, %c0_i32_0 : i32, i32, i32
  }
  func.func @transform_4(%arg0: i32) -> (i32, i32, i32) {
    %c0_i32 = arith.constant 0 : i32
    %c0_i32_0 = arith.constant 0 : i32
    %c0_i32_1 = arith.constant 0 : i32
    return %arg0, %c0_i32, %c0_i32_0 : i32, i32, i32
  }
}

module attributes {stable_mosaic.version = 11 : i64} {
  func.func @kernel(%arg0: i32, %arg1: memref<1x200x256xf32, #tpu.memory_space<vmem>>, %arg2: memref<4x200xf32, #tpu.memory_space<vmem>>, %arg3: memref<4x1xf32, #tpu.memory_space<vmem>>, %arg4: memref<1x4x256xf32, #tpu.memory_space<vmem>>) attributes {dimension_semantics = [#tpu.dimension_semantics<parallel>], iteration_bounds = array<i64: 2>, scalar_prefetch = 0 : i64, scratch_operands = 0 : i64, tpu.core_type = #tpu.core_type<tc>, window_params = [{transform_indices = @transform_0, window_bounds = array<i64: 1, 200, 256>}, {pipeline_mode = #tpu.pipeline_mode<synchronous>, transform_indices = @transform_1, window_bounds = array<i64: 4, 200>}, {pipeline_mode = #tpu.pipeline_mode<synchronous>, transform_indices = @transform_2, window_bounds = array<i64: 4, 1>}, {transform_indices = @transform_3, window_bounds = array<i64: 1, 4, 256>}]} {
    %c0 = arith.constant 0 : index
    %c0_0 = arith.constant 0 : index
    %0 = vector.load %arg2[%c0, %c0_0] : memref<4x200xf32, #tpu.memory_space<vmem>>, vector<4x200xf32>
    %c0_1 = arith.constant 0 : index
    %c0_2 = arith.constant 0 : index
    %c0_3 = arith.constant 0 : index
    %1 = vector.load %arg1[%c0_1, %c0_2, %c0_3] : memref<1x200x256xf32, #tpu.memory_space<vmem>>, vector<1x200x256xf32>
    %2 = vector.shape_cast %1 : vector<1x200x256xf32> to vector<200x256xf32>
    %cst = arith.constant dense<0.000000e+00> : vector<4x256xf32>
    %3 = tpu.matmul %0, %2, %cst {dimension_numbers = #tpu.dot_dimension_numbers<[1], [0], [0], [1], [0, 0, 1, 1], [], []>} : vector<4x200xf32>, vector<200x256xf32>, vector<4x256xf32> -> vector<4x256xf32>
    %c0_4 = arith.constant 0 : index
    %c0_5 = arith.constant 0 : index
    %4 = vector.load %arg3[%c0_4, %c0_5] : memref<4x1xf32, #tpu.memory_space<vmem>>, vector<4x1xf32>
    %5 = vector.broadcast %4 : vector<4x1xf32> to vector<4x256xf32>
    %6 = arith.addf %3, %5 : vector<4x256xf32>
    %cst_6 = arith.constant dense<0.000000e+00> : vector<4xf32>
    %7 = vector.multi_reduction <add>, %6, %cst_6 [1] : vector<4x256xf32> to vector<4xf32>
    %8 = vector.shape_cast %7 : vector<4xf32> to vector<4x1xf32>
    %cst_7 = arith.constant 2.560000e+02 : f32
    %9 = vector.broadcast %cst_7 : f32 to vector<4x1xf32>
    %10 = arith.divf %8, %9 : vector<4x1xf32>
    %11 = vector.broadcast %10 : vector<4x1xf32> to vector<4x256xf32>
    %12 = arith.subf %6, %11 : vector<4x256xf32>
    %13 = arith.mulf %12, %12 : vector<4x256xf32>
    %cst_8 = arith.constant dense<0.000000e+00> : vector<4xf32>
    %14 = vector.multi_reduction <add>, %13, %cst_8 [1] : vector<4x256xf32> to vector<4xf32>
    %15 = vector.shape_cast %14 : vector<4xf32> to vector<4x1xf32>
    %cst_9 = arith.constant 2.560000e+02 : f32
    %16 = vector.broadcast %cst_9 : f32 to vector<4x1xf32>
    %17 = arith.divf %15, %16 : vector<4x1xf32>
    %18 = vector.broadcast %10 : vector<4x1xf32> to vector<4x256xf32>
    %19 = arith.subf %6, %18 : vector<4x256xf32>
    %cst_10 = arith.constant 9.99999974E-6 : f32
    %20 = vector.broadcast %cst_10 : f32 to vector<4x1xf32>
    %21 = arith.addf %17, %20 : vector<4x1xf32>
    %22 = math.rsqrt %21 : vector<4x1xf32>
    %23 = vector.broadcast %22 : vector<4x1xf32> to vector<4x256xf32>
    %24 = arith.mulf %19, %23 : vector<4x256xf32>
    %cst_11 = arith.constant 0.000000e+00 : f32
    %25 = vector.broadcast %cst_11 : f32 to vector<4x256xf32>
    %26 = arith.maximumf %24, %25 : vector<4x256xf32>
    %c0_12 = arith.constant 0 : index
    %c0_13 = arith.constant 0 : index
    %c0_14 = arith.constant 0 : index
    %27 = vector.load %arg4[%c0_12, %c0_13, %c0_14] : memref<1x4x256xf32, #tpu.memory_space<vmem>>, vector<1x4x256xf32>
    %28 = vector.shape_cast %27 : vector<1x4x256xf32> to vector<4x256xf32>
    %29 = vector.shape_cast %26 : vector<4x256xf32> to vector<1x4x256xf32>
    tpu.vector_store %arg4[%c0_12, %c0_13, %c0_14], %29 {strides = array<i32>} : memref<1x4x256xf32, #tpu.memory_space<vmem>>, vector<1x4x256xf32>,
    return
  }
  func.func @transform_0(%arg0: i32) -> (i32, i32, i32) {
    %c0_i32 = arith.constant 0 : i32
    %c0_i32_0 = arith.constant 0 : i32
    %c0_i32_1 = arith.constant 0 : i32
    return %arg0, %c0_i32, %c0_i32_0 : i32, i32, i32
  }
  func.func @transform_1(%arg0: i32) -> (i32, i32) {
    %c0_i32 = arith.constant 0 : i32
    %c0_i32_0 = arith.constant 0 : i32
    %c0_i32_1 = arith.constant 0 : i32
    return %c0_i32, %c0_i32_0 : i32, i32
  }
  func.func @transform_2(%arg0: i32) -> (i32, i32) {
    %c0_i32 = arith.constant 0 : i32
    %c0_i32_0 = arith.constant 0 : i32
    %c0_i32_1 = arith.constant 0 : i32
    return %c0_i32, %c0_i32_0 : i32, i32
  }
  func.func @transform_3(%arg0: i32) -> (i32, i32, i32) {
    %c0_i32 = arith.constant 0 : i32
    %c0_i32_0 = arith.constant 0 : i32
    %c0_i32_1 = arith.constant 0 : i32
    return %arg0, %c0_i32, %c0_i32_0 : i32, i32, i32
  }
}

module attributes {stable_mosaic.version = 11 : i64} {
  func.func @kernel(%arg0: i32, %arg1: memref<1x196x256xf32, #tpu.memory_space<vmem>>, %arg2: memref<3x196xf32, #tpu.memory_space<vmem>>, %arg3: memref<3x1xf32, #tpu.memory_space<vmem>>, %arg4: memref<1x3x256xf32, #tpu.memory_space<vmem>>) attributes {dimension_semantics = [#tpu.dimension_semantics<parallel>], iteration_bounds = array<i64: 2>, scalar_prefetch = 0 : i64, scratch_operands = 0 : i64, tpu.core_type = #tpu.core_type<tc>, window_params = [{transform_indices = @transform_0, window_bounds = array<i64: 1, 196, 256>}, {pipeline_mode = #tpu.pipeline_mode<synchronous>, transform_indices = @transform_1, window_bounds = array<i64: 3, 196>}, {pipeline_mode = #tpu.pipeline_mode<synchronous>, transform_indices = @transform_2, window_bounds = array<i64: 3, 1>}, {transform_indices = @transform_3, window_bounds = array<i64: 1, 3, 256>}]} {
    %c0 = arith.constant 0 : index
    %c0_0 = arith.constant 0 : index
    %0 = vector.load %arg2[%c0, %c0_0] : memref<3x196xf32, #tpu.memory_space<vmem>>, vector<3x196xf32>
    %c0_1 = arith.constant 0 : index
    %c0_2 = arith.constant 0 : index
    %c0_3 = arith.constant 0 : index
    %1 = vector.load %arg1[%c0_1, %c0_2, %c0_3] : memref<1x196x256xf32, #tpu.memory_space<vmem>>, vector<1x196x256xf32>
    %2 = vector.shape_cast %1 : vector<1x196x256xf32> to vector<196x256xf32>
    %cst = arith.constant dense<0.000000e+00> : vector<3x256xf32>
    %3 = tpu.matmul %0, %2, %cst {dimension_numbers = #tpu.dot_dimension_numbers<[1], [0], [0], [1], [0, 0, 1, 1], [], []>} : vector<3x196xf32>, vector<196x256xf32>, vector<3x256xf32> -> vector<3x256xf32>
    %c0_4 = arith.constant 0 : index
    %c0_5 = arith.constant 0 : index
    %4 = vector.load %arg3[%c0_4, %c0_5] : memref<3x1xf32, #tpu.memory_space<vmem>>, vector<3x1xf32>
    %5 = vector.broadcast %4 : vector<3x1xf32> to vector<3x256xf32>
    %6 = arith.addf %3, %5 : vector<3x256xf32>
    %7 = math.tanh %6 : vector<3x256xf32>
    %c0_6 = arith.constant 0 : index
    %c0_7 = arith.constant 0 : index
    %c0_8 = arith.constant 0 : index
    %8 = vector.load %arg4[%c0_6, %c0_7, %c0_8] : memref<1x3x256xf32, #tpu.memory_space<vmem>>, vector<1x3x256xf32>
    %9 = vector.shape_cast %8 : vector<1x3x256xf32> to vector<3x256xf32>
    %10 = vector.shape_cast %7 : vector<3x256xf32> to vector<1x3x256xf32>
    tpu.vector_store %arg4[%c0_6, %c0_7, %c0_8], %10 {strides = array<i32>} : memref<1x3x256xf32, #tpu.memory_space<vmem>>, vector<1x3x256xf32>,
    return
  }
  func.func @transform_0(%arg0: i32) -> (i32, i32, i32) {
    %c0_i32 = arith.constant 0 : i32
    %c0_i32_0 = arith.constant 0 : i32
    %c0_i32_1 = arith.constant 0 : i32
    return %arg0, %c0_i32, %c0_i32_0 : i32, i32, i32
  }
  func.func @transform_1(%arg0: i32) -> (i32, i32) {
    %c0_i32 = arith.constant 0 : i32
    %c0_i32_0 = arith.constant 0 : i32
    %c0_i32_1 = arith.constant 0 : i32
    return %c0_i32, %c0_i32_0 : i32, i32
  }
  func.func @transform_2(%arg0: i32) -> (i32, i32) {
    %c0_i32 = arith.constant 0 : i32
    %c0_i32_0 = arith.constant 0 : i32
    %c0_i32_1 = arith.constant 0 : i32
    return %c0_i32, %c0_i32_0 : i32, i32
  }
  func.func @transform_3(%arg0: i32) -> (i32, i32, i32) {
    %c0_i32 = arith.constant 0 : i32
    %c0_i32_0 = arith.constant 0 : i32
    %c0_i32_1 = arith.constant 0 : i32
    return %arg0, %c0_i32, %c0_i32_0 : i32, i32, i32
  }
}

</mosaic_0001>

<bundles_post_ra>
// kernel: decoder_forward.4
= control target key start
LH: loop header
LB: loop body
LE: loop exit
PB: predicated region body
PF: predicated region fallthrough
CT: control target
= control target key end

     0   :  { %8 = vsyncpa [#allocation3], 0  ;;  %s501_s12 = smov 0   ;;  %s567_s0 = inlined_call_operand.vmem [shape: f32[2,72,64], index: 0, kind: input, shape index: {}]   ;;  %s568_s1 = inlined_call_operand.hbm [shape: f32[8,72], index: 1, kind: input, shape index: {}]   ;;  %s569_s2 = inlined_call_operand.vmem [shape: f32[8,1], index: 2, kind: input, shape index: {}]   ;;  %s570_s3 = inlined_call_operand.vmem [shape: f32[2,8,64], index: 3, kind: output, shape index: {}]  }
   0x1 LB: > { %s507_s13 = sadd.s32 4294967295, %s474_s12   ;;  %p356_p0 = scmp.ge.s32.totalorder %s474_s12, 1  ;;  %s474_s12 = sphi %s501_s12, %s14_s12  }
   0x2   : > { %p113_p1 = scmp.lt.s32.totalorder %s474_s12, 3  ;;  %p571_p3 = scmp.eq.s32.totalorder %s507_s13, 0 }
   0x3   : > { %s476_s15 = smov [#allocation2]   ;;  %s436_s20 = scalar_lea.hbm %s568_s1, 128 }
   0x4   : > { %p511_p2 = pnand %p356_p0, %p113_p1  ;;  %s126_s16 = sshll.u32 %s476_s15, 4  ;;  %s127_s16 = int_to_ptr.vmem [resolvable:$true] %s126_s16 }
   0x5   : > { %p437_p6 = scmp.ne.s32.totalorder %s568_s1, %s436_s20  ;;  %p443_p10 = scmp.lt.u32.totalorder %s436_s20, %s568_s1 }
   0x6   : > { %s573_s14 = scalar_select %p511_p2, 1, 0 }
   0x7   : > { %p414_p4 = pneg %p511_p2 }
   0x9   : > { %p520_p5 = pnand %p571_p3, %p414_p4 }
   0xb   : > { %p438_p7 = pneg %p520_p5 }
   0xd   : > { %p439_p8 = pnand %p438_p7, %p437_p6 }
   0xf   : > { %p440_p9 = pneg %p439_p8 }
  0x11   : > { %p445_p11 = pnand %p443_p10, %p440_p9 }
  0x13   : > { %448 = shalt.err (!%p445_p11)
}
  0x14   : > { %s449_s25 = scalar_lea.vmem %s127_s16, 128  ;;  %p457_p1 = scmp.lt.s32.totalorder %s127_s16, %s127_s16 }
  0x15   : > { %p450_p12 = scmp.ne.s32.totalorder %s127_s16, %s449_s25  ;;  %p458_p4 = scmp.lt.s32.totalorder %s449_s25, %s449_s25 }
  0x17   : > { %p452_p13 = pnand %p450_p12, %p438_p7  ;;  %p459_p3 = por %p458_p4, %p457_p1 }
  0x19   : > { %p453_p0 = pneg %p452_p13 }
  0x1b   : > { %p460_p2 = pnand %p459_p3, %p453_p0 }
  0x1d   : > { %463 = shalt.err (!%p460_p2)
}
  0x1e   : > { %417 = dma.hbm_to_vmem [thread:$0]  (!%p520_p5), %s568_s1, 128, %s127_s16, [#allocation3]  }
  0x1f   : > { %p575_p6 = scmp.ne.s32.totalorder %s573_s14, 0 }
  0x20   : > { %p576_p8 = scmp.eq.s32.totalorder (!%p575_p6), %s507_s13, 0 }
  0x21   : > { %150 = sbr.rel (%p575_p6) target bundleno = 593 (0x251), region = 32 }
  0x28   : > { %469 = dma.done.wait (%p576_p8), [#allocation3], 128   ;;  %p577_p7 = pmov %p576_p8 }
  0x29   : > { %p173_p9 = scmp.lt.s32.totalorder %s507_s13, 1  ;;  %v477_v0 = vmov 0.0|0.0   ;;  %vm478_vm0 = vmmov 0   ;;  %v479_v1 = vmov 0.0   ;;  %v480_v2 = vmov 0   ;;  %v192_v9 = vld [vmem:[%s569_s2] sm:$0xff] }
  0x2a   : > { %471 = vsyncadd (%p577_p7), [#allocation3], 4294967168  ;;  %397 = vmatprep.subr.bf16.mxu0 %v477_v0  ;;  %394 = vmatprep.mubr.msk.f32.mxu0 %vm478_vm0, %v479_v1  ;;  %v182_v17 = vld [vmem:[#allocation2] sm:$0xff]  ;;  %vm198_vm1 = vcmask 588800   ;;  %vm272_vm2 = vcmask 523264  }
  0x2b   : > { %s579_s13 = smov (!%p173_p9, %s507_s13), 1  ;;  %433 = vset.pattern.permute.xlu0 %v480_v2 }
  0x2c   : > { %s409_s28 = smul.u32 72, %s579_s13  ;;  %195 = vperm.xlu0 %433, %v192_v9   ;;  %s362_s7 = sshll.u32 %s579_s13, 3 }
  0x2d   : > { %s181_s10 = scalar_lea.vmem %s570_s3, %s362_s7 }
  0x2e   : > { %s177_s4 = scalar_lea.vmem %s567_s0, %s409_s28 }
  0x2f   : > { %v183_v3 = vld [vmem:[%s177_s4] sm:$0xff]  ;;  %v184_v4 = vld [vmem:[%s177_s4 + $0x8] sm:$0xff]  ;;  %v185_v5 = vld [vmem:[%s177_s4 + $0x10] sm:$0xff] }
  0x30   : > { %v398_v6 = vpack.c.bf16 %v184_v4, %v183_v3  ;;  %v186_v7 = vld [vmem:[%s177_s4 + $0x18] sm:$0xff]  ;;  %v187_v10 = vld [vmem:[%s177_s4 + $0x20] sm:$0xff]  ;;  %v188_v11 = vld [vmem:[%s177_s4 + $0x28] sm:$0xff] }
  0x31   : > { %v401_v8 = vpack.c.bf16 %v186_v7, %v185_v5  ;;  %v404_v12 = vpack.c.bf16 %v188_v11, %v187_v10  ;;  %v189_v13 = vld [vmem:[%s177_s4 + $0x30] sm:$0xff]  ;;  %v190_v14 = vld [vmem:[%s177_s4 + $0x38] sm:$0xff]  ;;  %v191_v16 = vld [vmem:[%s177_s4 + $0x40] sm:$0xff] }
  0x32   : > { %399 = vmatpush3.bf16.msra.mxu0 %v398_v6  ;;  %v407_v15 = vpack.c.bf16 %v190_v14, %v189_v13 }
  0x33   : > { %400 = vmatprep.subr.bf16.mxu0 %v477_v0 }
  0x36   : > { %402 = vmatpush3.bf16.msra.mxu0 %v401_v8 }
  0x37   : > { %403 = vmatprep.subr.bf16.mxu0 %v477_v0 }
  0x3a   : > { %405 = vmatpush3.bf16.msra.mxu0 %v404_v12 }
  0x3b   : > { %406 = vmatprep.subr.bf16.mxu0 %v477_v0 }
  0x3e   : > { %408 = vmatpush3.bf16.msra.mxu0 %v407_v15 }
  0x3f   : > { %392 = vmatprep.subr.mxu0 %v479_v1 }
  0x42   : > { %393 = vmatpush3.msra.mxu0 %v191_v16 }
  0x43   : > { %395 = vmatmul.mubr.msk.f32.vlgmr.msra.gmra.mrb[0].mxu0 %vm198_vm1, %v182_v17 }
  0xab   : > { %v196_v18 = vpop.permute.xlu0 %195 }
 0x116   : > { %v268_v19 = vpop.f32.mrb[0].mxu0 }
 0x117   : > { %v269_v20 = vadd.f32 %v268_v19, %v196_v18  ;;  %v396_v21 = vpop.f32.mrb[1].mxu0 }
 0x119   : > { %v273_v22 = vsel %vm272_vm2, %v269_v20, 0.0 }
 0x11a   : > { %274 = vadd.xlane.f32.xlu0 %v273_v22 }
 0x1a7   : > { %v275_v23 = vpop.xlane.xlu0 %274 }
 0x1a8   : > { %v277_v24 = vmul.f32 0.015625, %v275_v23 }
 0x1aa   : > { %v278_v25 = vsub.f32 %v269_v20, %v277_v24 }
 0x1ac   : > { %v279_v26 = vmul.f32 %v278_v25, %v278_v25 }
 0x1ae   : > { %v280_v27 = vsel %vm272_vm2, %v279_v26, 0.0 }
 0x1af   : > { %281 = vadd.xlane.f32.xlu1 %v280_v27 }
 0x23c   : > { %v282_v28 = vpop.xlane.xlu1 %281 }
 0x23d   : > { %v283_v29 = vmul.f32 0.015625, %v282_v28 }
 0x23f   : > { %v284_v30 = vadd.f32 1e-05, %v283_v29 }
 0x241   : > { %434 = vrsqrt.f32 %v284_v30 }
 0x24b   : > { %v435_v31 = vpop.eup %434 }
 0x24c   : > { %v286_v32 = vmul.f32 %v435_v31, %v278_v25 }
 0x24e   : > { %v287_v33 = vmax.f32 %v286_v32, 0.0 }
 0x250   : > { %288 = vst.msk [vmem:[%s181_s10] sm:$0xff] %vm272_vm2, %v287_v33 }
 0x251 PF: > { %s14_s12 = sadd.s32 1, %s474_s12  }
 0x252   : > { %p11_p2 = scmp.ge.s32.totalorder %s14_s12, 4  }
 0x254   :  { %13 = sbr.rel (!%p11_p2) target bundleno = 1 (0x1), region = 67 }
 0x25b   :  { %308 = vsyncpa [#allocation3], 1 }
 0x25c   :  { %310 = vsyncpa [#allocation3 + $0x1], 1 }

// kernel: decoder_forward.5
= control target key start
LH: loop header
LB: loop body
LE: loop exit
PB: predicated region body
PF: predicated region fallthrough
CT: control target
= control target key end

     0   :  { %9 = vsyncpa [#allocation3], 0  ;;  %s564_s15 = smov 0   ;;  %s633_s0 = inlined_call_operand.vmem [shape: f32[2,72,64], index: 0, kind: input, shape index: {}]   ;;  %s634_s1 = inlined_call_operand.hbm [shape: f32[8,72], index: 1, kind: input, shape index: {}]   ;;  %s635_s2 = inlined_call_operand.vmem [shape: f32[8,1], index: 2, kind: input, shape index: {}]   ;;  %s636_s3 = inlined_call_operand.vmem [shape: f32[2,8,64], index: 3, kind: input, shape index: {}]   ;;  %s637_s4 = inlined_call_operand.vmem [shape: f32[2,8,64], index: 4, kind: output, shape index: {}]  }
   0x1 LB: > { %s570_s16 = sadd.s32 4294967295, %s532_s15   ;;  %p413_p0 = scmp.ge.s32.totalorder %s532_s15, 1  ;;  %s532_s15 = sphi %s564_s15, %s15_s15  }
   0x2   : > { %p140_p1 = scmp.lt.s32.totalorder %s532_s15, 3  ;;  %p638_p3 = scmp.eq.s32.totalorder %s570_s16, 0 }
   0x3   : > { %s534_s18 = smov [#allocation2]   ;;  %s494_s23 = scalar_lea.hbm %s634_s1, 128 }
   0x4   : > { %p574_p2 = pnand %p413_p0, %p140_p1  ;;  %s153_s19 = sshll.u32 %s534_s18, 4  ;;  %s154_s19 = int_to_ptr.vmem [resolvable:$true] %s153_s19 }
   0x5   : > { %p495_p6 = scmp.ne.s32.totalorder %s634_s1, %s494_s23  ;;  %p501_p10 = scmp.lt.u32.totalorder %s494_s23, %s634_s1 }
   0x6   : > { %s640_s17 = scalar_select %p574_p2, 1, 0 }
   0x7   : > { %p472_p4 = pneg %p574_p2 }
   0x9   : > { %p583_p5 = pnand %p638_p3, %p472_p4 }
   0xb   : > { %p496_p7 = pneg %p583_p5 }
   0xd   : > { %p497_p8 = pnand %p496_p7, %p495_p6 }
   0xf   : > { %p498_p9 = pneg %p497_p8 }
  0x11   : > { %p503_p11 = pnand %p501_p10, %p498_p9 }
  0x13   : > { %506 = shalt.err (!%p503_p11)
}
  0x14   : > { %s507_s28 = scalar_lea.vmem %s154_s19, 128  ;;  %p515_p1 = scmp.lt.s32.totalorder %s154_s19, %s154_s19 }
  0x15   : > { %p508_p12 = scmp.ne.s32.totalorder %s154_s19, %s507_s28  ;;  %p516_p4 = scmp.lt.s32.totalorder %s507_s28, %s507_s28 }
  0x17   : > { %p510_p13 = pnand %p508_p12, %p496_p7  ;;  %p517_p3 = por %p516_p4, %p515_p1 }
  0x19   : > { %p511_p0 = pneg %p510_p13 }
  0x1b   : > { %p518_p2 = pnand %p517_p3, %p511_p0 }
  0x1d   : > { %521 = shalt.err (!%p518_p2)
}
  0x1e   : > { %475 = dma.hbm_to_vmem [thread:$0]  (!%p583_p5), %s634_s1, 128, %s154_s19, [#allocation3]  }
  0x1f   : > { %p642_p6 = scmp.ne.s32.totalorder %s640_s17, 0 }
  0x20   : > { %p643_p8 = scmp.eq.s32.totalorder (!%p642_p6), %s570_s16, 0 }
  0x21   : > { %184 = sbr.rel (%p642_p6) target bundleno = 593 (0x251), region = 36 }
  0x28   : > { %527 = dma.done.wait (%p643_p8), [#allocation3], 128   ;;  %p644_p7 = pmov %p643_p8 }
  0x29   : > { %p213_p9 = scmp.lt.s32.totalorder %s570_s16, 1  ;;  %v535_v0 = vmov 0.0|0.0   ;;  %vm536_vm0 = vmmov 0   ;;  %v537_v1 = vmov 0.0   ;;  %v538_v2 = vmov 0   ;;  %v236_v9 = vld [vmem:[%s635_s2] sm:$0xff] }
  0x2a   : > { %529 = vsyncadd (%p644_p7), [#allocation3], 4294967168  ;;  %455 = vmatprep.subr.bf16.mxu0 %v535_v0  ;;  %452 = vmatprep.mubr.msk.f32.mxu0 %vm536_vm0, %v537_v1  ;;  %v226_v17 = vld [vmem:[#allocation2] sm:$0xff]  ;;  %vm242_vm1 = vcmask 588800   ;;  %vm316_vm2 = vcmask 523264  }
  0x2b   : > { %s646_s16 = smov (!%p213_p9, %s570_s16), 1  ;;  %491 = vset.pattern.permute.xlu0 %v538_v2 }
  0x2c   : > { %s467_s5 = smul.u32 72, %s646_s16  ;;  %239 = vperm.xlu0 %491, %v236_v9   ;;  %s419_s11 = sshll.u32 %s646_s16, 3 }
  0x2d   : > { %s221_s14 = scalar_lea.vmem %s636_s3, %s419_s11  ;;  %s225_s19 = scalar_lea.vmem %s637_s4, %s419_s11 }
  0x2e   : > { %s217_s8 = scalar_lea.vmem %s633_s0, %s467_s5  ;;  %v331_v32 = vld [vmem:[%s221_s14] sm:$0xff] }
  0x2f   : > { %v227_v3 = vld [vmem:[%s217_s8] sm:$0xff]  ;;  %v228_v4 = vld [vmem:[%s217_s8 + $0x8] sm:$0xff]  ;;  %v229_v5 = vld [vmem:[%s217_s8 + $0x10] sm:$0xff] }
  0x30   : > { %v456_v6 = vpack.c.bf16 %v228_v4, %v227_v3  ;;  %v230_v7 = vld [vmem:[%s217_s8 + $0x18] sm:$0xff]  ;;  %v231_v10 = vld [vmem:[%s217_s8 + $0x20] sm:$0xff]  ;;  %v232_v11 = vld [vmem:[%s217_s8 + $0x28] sm:$0xff] }
  0x31   : > { %v459_v8 = vpack.c.bf16 %v230_v7, %v229_v5  ;;  %v462_v12 = vpack.c.bf16 %v232_v11, %v231_v10  ;;  %v233_v13 = vld [vmem:[%s217_s8 + $0x30] sm:$0xff]  ;;  %v234_v14 = vld [vmem:[%s217_s8 + $0x38] sm:$0xff]  ;;  %v235_v16 = vld [vmem:[%s217_s8 + $0x40] sm:$0xff] }
  0x32   : > { %457 = vmatpush3.bf16.msra.mxu0 %v456_v6  ;;  %v465_v15 = vpack.c.bf16 %v234_v14, %v233_v13 }
  0x33   : > { %458 = vmatprep.subr.bf16.mxu0 %v535_v0 }
  0x36   : > { %460 = vmatpush3.bf16.msra.mxu0 %v459_v8 }
  0x37   : > { %461 = vmatprep.subr.bf16.mxu0 %v535_v0 }
  0x3a   : > { %463 = vmatpush3.bf16.msra.mxu0 %v462_v12 }
  0x3b   : > { %464 = vmatprep.subr.bf16.mxu0 %v535_v0 }
  0x3e   : > { %466 = vmatpush3.bf16.msra.mxu0 %v465_v15 }
  0x3f   : > { %450 = vmatprep.subr.mxu0 %v537_v1 }
  0x42   : > { %451 = vmatpush3.msra.mxu0 %v235_v16 }
  0x43   : > { %453 = vmatmul.mubr.msk.f32.vlgmr.msra.gmra.mrb[0].mxu0 %vm242_vm1, %v226_v17 }
  0xab   : > { %v240_v18 = vpop.permute.xlu0 %239 }
 0x116   : > { %v312_v19 = vpop.f32.mrb[0].mxu0 }
 0x117   : > { %v313_v20 = vadd.f32 %v312_v19, %v240_v18  ;;  %v454_v21 = vpop.f32.mrb[1].mxu0 }
 0x119   : > { %v317_v22 = vsel %vm316_vm2, %v313_v20, 0.0 }
 0x11a   : > { %318 = vadd.xlane.f32.xlu0 %v317_v22 }
 0x1a7   : > { %v319_v23 = vpop.xlane.xlu0 %318 }
 0x1a8   : > { %v321_v24 = vmul.f32 0.015625, %v319_v23 }
 0x1aa   : > { %v322_v25 = vsub.f32 %v313_v20, %v321_v24 }
 0x1ac   : > { %v323_v26 = vmul.f32 %v322_v25, %v322_v25 }
 0x1ae   : > { %v324_v27 = vsel %vm316_vm2, %v323_v26, 0.0 }
 0x1af   : > { %325 = vadd.xlane.f32.xlu1 %v324_v27 }
 0x23c   : > { %v326_v28 = vpop.xlane.xlu1 %325 }
 0x23d   : > { %v327_v29 = vmul.f32 0.015625, %v326_v28 }
 0x23f   : > { %v328_v30 = vadd.f32 1e-05, %v327_v29 }
 0x241   : > { %492 = vrsqrt.f32 %v328_v30 }
 0x24b   : > { %v493_v31 = vpop.eup %492 }
 0x24c   : > { %v330_v33 = vmul.f32 %v493_v31, %v322_v25 }
 0x24e   : > { %v332_v34 = vadd.f32 %v331_v32, %v330_v33 }
 0x250   : > { %333 = vst.msk [vmem:[%s225_s19] sm:$0xff] %vm316_vm2, %v332_v34 }
 0x251 PF: > { %s15_s15 = sadd.s32 1, %s532_s15  }
 0x252   : > { %p12_p2 = scmp.ge.s32.totalorder %s15_s15, 4  }
 0x254   :  { %14 = sbr.rel (!%p12_p2) target bundleno = 1 (0x1), region = 74 }
 0x25b   :  { %353 = vsyncpa [#allocation3], 1 }
 0x25c   :  { %355 = vsyncpa [#allocation3 + $0x1], 1 }

// kernel: decoder_forward.6
= control target key start
LH: loop header
LB: loop body
LE: loop exit
PB: predicated region body
PF: predicated region fallthrough
CT: control target
= control target key end

     0   :  { %8 = vsyncpa [#allocation3], 0  ;;  %s562_s12 = smov 0   ;;  %s682_s0 = inlined_call_operand.vmem [shape: f32[2,200,256], index: 0, kind: input, shape index: {}]   ;;  %s683_s1 = inlined_call_operand.hbm [shape: f32[4,200], index: 1, kind: input, shape index: {}]   ;;  %s684_s2 = inlined_call_operand.vmem [shape: f32[4,1], index: 2, kind: input, shape index: {}]   ;;  %s685_s3 = inlined_call_operand.vmem [shape: f32[2,4,256], index: 3, kind: output, shape index: {}]  }
   0x1 LB: > { %s568_s13 = sadd.s32 4294967295, %s538_s12   ;;  %p415_p0 = scmp.ge.s32.totalorder %s538_s12, 1  ;;  %s538_s12 = sphi %s562_s12, %s14_s12  }
   0x2   : > { %p113_p1 = scmp.lt.s32.totalorder %s538_s12, 3  ;;  %p686_p3 = scmp.eq.s32.totalorder %s568_s13, 0 }
   0x3   : > { %s540_s15 = smov [#allocation2]   ;;  %s500_s20 = scalar_lea.hbm %s683_s1, 128 }
   0x4   : > { %p572_p2 = pnand %p415_p0, %p113_p1  ;;  %s126_s16 = sshll.u32 %s540_s15, 4  ;;  %s127_s16 = int_to_ptr.vmem [resolvable:$true] %s126_s16 }
   0x5   : > { %p501_p6 = scmp.ne.s32.totalorder %s683_s1, %s500_s20  ;;  %p507_p10 = scmp.lt.u32.totalorder %s500_s20, %s683_s1 }
   0x6   : > { %s688_s14 = scalar_select %p572_p2, 1, 0 }
   0x7   : > { %p480_p4 = pneg %p572_p2 }
   0x9   : > { %p581_p5 = pnand %p686_p3, %p480_p4 }
   0xb   : > { %p502_p7 = pneg %p581_p5 }
   0xd   : > { %p503_p8 = pnand %p502_p7, %p501_p6 }
   0xf   : > { %p504_p9 = pneg %p503_p8 }
  0x11   : > { %p509_p11 = pnand %p507_p10, %p504_p9 }
  0x13   : > { %512 = shalt.err (!%p509_p11)
}
  0x14   : > { %s513_s25 = scalar_lea.vmem %s127_s16, 128  ;;  %p521_p1 = scmp.lt.s32.totalorder %s127_s16, %s127_s16 }
  0x15   : > { %p514_p12 = scmp.ne.s32.totalorder %s127_s16, %s513_s25  ;;  %p522_p4 = scmp.lt.s32.totalorder %s513_s25, %s513_s25 }
  0x17   : > { %p516_p13 = pnand %p514_p12, %p502_p7  ;;  %p523_p3 = por %p522_p4, %p521_p1 }
  0x19   : > { %p517_p0 = pneg %p516_p13 }
  0x1b   : > { %p524_p2 = pnand %p523_p3, %p517_p0 }
  0x1d   : > { %527 = shalt.err (!%p524_p2)
}
  0x1e   : > { %483 = dma.hbm_to_vmem [thread:$0]  (!%p581_p5), %s683_s1, 128, %s127_s16, [#allocation3]  }
  0x1f   : > { %p690_p6 = scmp.ne.s32.totalorder %s688_s14, 0 }
  0x20   : > { %p691_p8 = scmp.eq.s32.totalorder (!%p690_p6), %s568_s13, 0 }
  0x21   : > { %150 = sbr.rel (%p690_p6) target bundleno = 633 (0x279), region = 32 }
  0x28   : > { %533 = dma.done.wait (%p691_p8), [#allocation3], 128   ;;  %p692_p7 = pmov %p691_p8 }
  0x29   : > { %p174_p9 = scmp.lt.s32.totalorder %s568_s13, 1  ;;  %v541_v0 = vmov 0   ;;  %v639_v33 = vld [vmem:[#allocation2] sm:$0xff]  ;;  %vm243_vm0 = vcmask 588800   ;;  %vm317_vm1 = vcmask 1043456  }
  0x2a   : > { %535 = vsyncadd (%p692_p7), [#allocation3], 4294967168  ;;  %496 = vset.pattern.permute.xlu0 %v541_v0  ;;  %v242_v37 = vcombine.high %v639_v33, %v639_v33  ;;  %v235_v38 = vld [vmem:[%s684_s2] sm:$0xf] }
  0x2b   : > { %s694_s13 = smov (!%p174_p9, %s568_s13), 1  ;;  %238 = vperm.xlu0 %496, %v235_v38  }
  0x2c   : > { %s475_s28 = smul.u32 400, %s694_s13  ;;  %423 = vmatprep.mubr.msk.f32.mxu0 %vm243_vm0, %v242_v37  ;;  %s426_s7 = sshll.u32 %s694_s13, 3 }
  0x2d   : > { %s183_s10 = scalar_lea.vmem %s685_s3, %s426_s7 }
  0x2e   : > { %s615_s4 = scalar_lea.vmem %s682_s0, %s475_s28 }
  0x2f   : > { %v186_v1 = vld [vmem:[%s615_s4 + $0x8] sm:$0xff]  ;;  %v188_v2 = vld [vmem:[%s615_s4 + $0x18] sm:$0xff]  ;;  %v185_v3 = vld [vmem:[%s615_s4] sm:$0xff] }
  0x30   : > { %v427_v4 = vpack.c.bf16 %v188_v2, %v186_v1  ;;  %v187_v5 = vld [vmem:[%s615_s4 + $0x10] sm:$0xff]  ;;  %v190_v6 = vld [vmem:[%s615_s4 + $0x28] sm:$0xff]  ;;  %v192_v7 = vld [vmem:[%s615_s4 + $0x38] sm:$0xff] }
  0x31   : > { %v429_v8 = vpack.c.bf16 %v187_v5, %v185_v3  ;;  %v431_v9 = vpack.c.bf16 %v192_v7, %v190_v6  ;;  %v189_v10 = vld [vmem:[%s615_s4 + $0x20] sm:$0xff]  ;;  %v191_v11 = vld [vmem:[%s615_s4 + $0x30] sm:$0xff]  ;;  %v194_v12 = vld [vmem:[%s615_s4 + $0x48] sm:$0xff] }
  0x32   : > { %428 = vmatprep.subr.bf16.mxu0 %v427_v4  ;;  %v196_v13 = vld [vmem:[%s615_s4 + $0x58] sm:$0xff]  ;;  %v433_v14 = vpack.c.bf16 %v191_v11, %v189_v10  ;;  %v193_v16 = vld [vmem:[%s615_s4 + $0x40] sm:$0xff]  ;;  %v195_v17 = vld [vmem:[%s615_s4 + $0x50] sm:$0xff] }
  0x33   : > { %430 = vmatpush1.bf16.msra.mxu0 %v429_v8  ;;  %v435_v15 = vpack.c.bf16 %v196_v13, %v194_v12  ;;  %v198_v18 = vld [vmem:[%s615_s4 + $0x68] sm:$0xff]  ;;  %v200_v19 = vld [vmem:[%s615_s4 + $0x78] sm:$0xff]  ;;  %v437_v20 = vpack.c.bf16 %v195_v17, %v193_v16  ;;  %v197_v22 = vld [vmem:[%s615_s4 + $0x60] sm:$0xff] }
  0x34   : > { %432 = vmatprep.subr.bf16.mxu0 %v431_v9  ;;  %v439_v21 = vpack.c.bf16 %v200_v19, %v198_v18  ;;  %v199_v23 = vld [vmem:[%s615_s4 + $0x70] sm:$0xff]  ;;  %v202_v24 = vld [vmem:[%s615_s4 + $0x88] sm:$0xff]  ;;  %v204_v25 = vld [vmem:[%s615_s4 + $0x98] sm:$0xff] }
  0x35   : > { %v441_v26 = vpack.c.bf16 %v199_v23, %v197_v22  ;;  %v443_v27 = vpack.c.bf16 %v204_v25, %v202_v24  ;;  %v201_v28 = vld [vmem:[%s615_s4 + $0x80] sm:$0xff]  ;;  %v203_v29 = vld [vmem:[%s615_s4 + $0x90] sm:$0xff]  ;;  %v206_v30 = vld [vmem:[%s615_s4 + $0xa8] sm:$0xff] }
  0x36   : > { %v208_v31 = vld [vmem:[%s615_s4 + $0xb8] sm:$0xff]  ;;  %v445_v32 = vpack.c.bf16 %v203_v29, %v201_v28  ;;  %v205_v35 = vld [vmem:[%s615_s4 + $0xa0] sm:$0xff]  ;;  %v207_v36 = vld [vmem:[%s615_s4 + $0xb0] sm:$0xff] }
  0x37   : > { %434 = vmatpush1.bf16.msra.mxu0 %v433_v14  ;;  %v447_v34 = vpack.c.bf16 %v208_v31, %v206_v30  ;;  %v210_v39 = vld [vmem:[%s615_s4 + $0xc8] sm:$0xff]  ;;  %v212_v40 = vld [vmem:[%s615_s4 + $0xd8] sm:$0xff]  ;;  %v449_v41 = vpack.c.bf16 %v207_v36, %v205_v35  ;;  %v209_v43 = vld [vmem:[%s615_s4 + $0xc0] sm:$0xff] }
  0x38   : > { %436 = vmatprep.subr.bf16.mxu0 %v435_v15  ;;  %v451_v42 = vpack.c.bf16 %v212_v40, %v210_v39  ;;  %v211_v44 = vld [vmem:[%s615_s4 + $0xd0] sm:$0xff]  ;;  %v214_v45 = vld [vmem:[%s615_s4 + $0xe8] sm:$0xff]  ;;  %v216_v46 = vld [vmem:[%s615_s4 + $0xf8] sm:$0xff] }
  0x39   : > { %v453_v47 = vpack.c.bf16 %v211_v44, %v209_v43  ;;  %v455_v48 = vpack.c.bf16 %v216_v46, %v214_v45  ;;  %v213_v49 = vld [vmem:[%s615_s4 + $0xe0] sm:$0xff]  ;;  %v215_v50 = vld [vmem:[%s615_s4 + $0xf0] sm:$0xff]  ;;  %v218_v51 = vld [vmem:[%s615_s4 + $0x108] sm:$0xff] }
  0x3a   : > { %v220_v52 = vld [vmem:[%s615_s4 + $0x118] sm:$0xff]  ;;  %v457_v53 = vpack.c.bf16 %v215_v50, %v213_v49  ;;  %v217_v55 = vld [vmem:[%s615_s4 + $0x100] sm:$0xff]  ;;  %v219_v56 = vld [vmem:[%s615_s4 + $0x110] sm:$0xff] }
  0x3b   : > { %438 = vmatpush1.bf16.msra.mxu0 %v437_v20  ;;  %v459_v54 = vpack.c.bf16 %v220_v52, %v218_v51  ;;  %v222_v57 = vld [vmem:[%s615_s4 + $0x128] sm:$0xff]  ;;  %v224_v58 = vld [vmem:[%s615_s4 + $0x138] sm:$0xff]  ;;  %v461_v59 = vpack.c.bf16 %v219_v56, %v217_v55  ;;  %v221_v61 = vld [vmem:[%s615_s4 + $0x120] sm:$0xff] }
  0x3c   : > { %440 = vmatprep.subr.bf16.mxu0 %v439_v21  ;;  %v463_v60 = vpack.c.bf16 %v224_v58, %v222_v57  ;;  %v223_v62 = vld [vmem:[%s615_s4 + $0x130] sm:$0xff]  ;;  %v226_v63 = vld [vmem:[%s615_s4 + $0x148] sm:$0xff]  ;;  %v228_v0 = vld [vmem:[%s615_s4 + $0x158] sm:$0xff] }
  0x3d   : > { %v465_v1 = vpack.c.bf16 %v223_v62, %v221_v61  ;;  %v467_v2 = vpack.c.bf16 %v228_v0, %v226_v63  ;;  %v225_v3 = vld [vmem:[%s615_s4 + $0x140] sm:$0xff]  ;;  %v227_v4 = vld [vmem:[%s615_s4 + $0x150] sm:$0xff]  ;;  %v230_v5 = vld [vmem:[%s615_s4 + $0x168] sm:$0xff] }
  0x3e   : > { %v232_v6 = vld [vmem:[%s615_s4 + $0x178] sm:$0xff]  ;;  %v469_v7 = vpack.c.bf16 %v227_v4, %v225_v3  ;;  %v229_v9 = vld [vmem:[%s615_s4 + $0x160] sm:$0xff]  ;;  %v231_v10 = vld [vmem:[%s615_s4 + $0x170] sm:$0xff] }
  0x3f   : > { %442 = vmatpush1.bf16.msra.mxu0 %v441_v26  ;;  %v471_v8 = vpack.c.bf16 %v232_v6, %v230_v5  ;;  %v473_v11 = vpack.c.bf16 %v231_v10, %v229_v9  ;;  %v234_v12 = vld [vmem:[%s615_s4 + $0x188] sm:$0xff]  ;;  %v233_v13 = vld [vmem:[%s615_s4 + $0x180] sm:$0xff] }
  0x40   : > { %444 = vmatprep.subr.bf16.mxu0 %v443_v27 }
  0x43   : > { %446 = vmatpush1.bf16.msra.mxu0 %v445_v32 }
  0x44   : > { %448 = vmatprep.subr.bf16.mxu0 %v447_v34 }
  0x47   : > { %450 = vmatpush1.bf16.msra.mxu0 %v449_v41 }
  0x48   : > { %452 = vmatprep.subr.bf16.mxu0 %v451_v42 }
  0x4b   : > { %454 = vmatpush1.bf16.msra.mxu0 %v453_v47 }
  0x4c   : > { %456 = vmatprep.subr.bf16.mxu0 %v455_v48 }
  0x4f   : > { %458 = vmatpush1.bf16.msra.mxu0 %v457_v53 }
  0x50   : > { %460 = vmatprep.subr.bf16.mxu0 %v459_v54 }
  0x53   : > { %462 = vmatpush1.bf16.msra.mxu0 %v461_v59 }
  0x54   : > { %464 = vmatprep.subr.bf16.mxu0 %v463_v60 }
  0x57   : > { %466 = vmatpush1.bf16.msra.mxu0 %v465_v1 }
  0x58   : > { %468 = vmatprep.subr.bf16.mxu0 %v467_v2 }
  0x5b   : > { %470 = vmatpush1.bf16.msra.mxu0 %v469_v7 }
  0x5c   : > { %472 = vmatprep.subr.bf16.mxu0 %v471_v8 }
  0x5f   : > { %474 = vmatpush1.bf16.msra.mxu0 %v473_v11 }
  0x60   : > { %294 = vmatprep.subr.mxu0 %v234_v12 }
  0x63   : > { %295 = vmatpush1.msra.mxu0 %v233_v13 }
  0x64   : > { %311 = vmatmul.mubr.f32.vlgmr.msra.gmra.mrb[0].mxu0 %v639_v33 }
  0xaa   : > { %v239_v14 = vpop.permute.xlu0 %238 }
 0x137   : > { %v312_v15 = vpop.f32.mrb[0].mxu0 }
 0x138   : > { %v313_v16 = vadd.f32 %v312_v15, %v239_v14  ;;  %v314_v17 = vpop.f32.mrb[1].mxu0 }
 0x139   : > { %v315_v18 = vadd.f32 %v314_v17, %v239_v14 }
 0x13a   : > { %v318_v19 = vsel %vm317_vm1, %v313_v16, 0.0 }
 0x13b   : > { %v319_v20 = vsel %vm317_vm1, %v315_v18, 0.0 }
 0x13c   : > { %v320_v21 = vadd.f32 %v319_v20, %v318_v19 }
 0x13e   : > { %321 = vadd.xlane.f32.xlu0 %v320_v21 }
 0x1cb   : > { %v322_v22 = vpop.xlane.xlu0 %321 }
 0x1cc   : > { %v324_v23 = vmul.f32 0.00390625, %v322_v22 }
 0x1ce   : > { %v325_v24 = vsub.f32 %v313_v16, %v324_v23  ;;  %v326_v25 = vsub.f32 %v315_v18, %v324_v23 }
 0x1d0   : > { %v327_v26 = vmul.f32 %v325_v24, %v325_v24  ;;  %v328_v27 = vmul.f32 %v326_v25, %v326_v25 }
 0x1d2   : > { %v329_v28 = vsel %vm317_vm1, %v327_v26, 0.0  ;;  %v330_v29 = vsel %vm317_vm1, %v328_v27, 0.0 }
 0x1d3   : > { %v331_v30 = vadd.f32 %v330_v29, %v329_v28 }
 0x1d5   : > { %332 = vadd.xlane.f32.xlu1 %v331_v30 }
 0x262   : > { %v333_v31 = vpop.xlane.xlu1 %332 }
 0x263   : > { %v334_v32 = vmul.f32 0.00390625, %v333_v31 }
 0x265   : > { %v335_v33 = vadd.f32 1e-05, %v334_v32 }
 0x267   : > { %498 = vrsqrt.f32 %v335_v33 }
 0x271   : > { %v499_v34 = vpop.eup %498 }
 0x272   : > { %v337_v35 = vmul.f32 %v499_v34, %v325_v24  ;;  %v338_v36 = vmul.f32 %v499_v34, %v326_v25 }
 0x274   : > { %v339_v37 = vmax.f32 %v337_v35, 0.0  ;;  %v340_v38 = vmax.f32 %v338_v36, 0.0 }
 0x276   : > { %v343_v39 = vcombine.low %v339_v37, %v340_v38 }
 0x278   : > { %345 = vst [vmem:[%s183_s10] sm:$0xff] %v343_v39 }
 0x279 PF: > { %s14_s12 = sadd.s32 1, %s538_s12  }
 0x27a   : > { %p11_p2 = scmp.ge.s32.totalorder %s14_s12, 4  }
 0x27c   :  { %13 = sbr.rel (!%p11_p2) target bundleno = 1 (0x1), region = 67 }
 0x283   :  { %367 = vsyncpa [#allocation3], 1 }
 0x284   :  { %369 = vsyncpa [#allocation3 + $0x1], 1 }

// kernel: decoder_forward.7
= control target key start
LH: loop header
LB: loop body
LE: loop exit
PB: predicated region body
PF: predicated region fallthrough
CT: control target
= control target key end

     0   :  { %s480_s12 = smov 0   ;;  %s564_s0 = inlined_call_operand.vmem [shape: f32[2,196,256], index: 0, kind: input, shape index: {}]   ;;  %s565_s1 = inlined_call_operand.vmem [shape: f32[3,196], index: 1, kind: input, shape index: {}]   ;;  %s566_s2 = inlined_call_operand.vmem [shape: f32[3,1], index: 2, kind: input, shape index: {}]   ;;  %s567_s3 = inlined_call_operand.vmem [shape: f32[2,3,256], index: 3, kind: output, shape index: {}]  }
   0x1 LB: > { %s373_s13 = sadd.s32 4294967295, %s457_s12   ;;  %p377_p0 = scmp.ge.s32.totalorder %s457_s12, 1  ;;  %s457_s12 = sphi %s480_s12, %s13_s12  }
   0x2   : > { %p137_p1 = scmp.lt.s32.totalorder %s457_s12, 3 }
   0x4   : > { %p138_p2 = pnand %p377_p0, %p137_p1 }
   0x5   : > { %p161_p3 = scmp.lt.s32.totalorder (!%p138_p2), %s373_s13, 1  ;;  %v491_v0 = vld [vmem:[%s565_s1] sm:$0x77] (!%p138_p2)  ;;  %vm230_vm0 = vcmask (!%p138_p2), 556032   ;;  %v459_v2 = vmov (!%p138_p2), 0   ;;  %vm233_vm1 = vcmask (!%p138_p2), 1043456  }
   0x6   : > { %141 = sbr.rel (%p138_p2) target bundleno = 299 (0x12b), region = 32  ;;  %v229_v1 = vcombine.high (!%p138_p2), %v491_v0, %v491_v0  ;;  %445 = vset.pattern.permute.xlu0 (!%p138_p2), %v459_v2  ;;  %v222_v3 = vld [vmem:[%s566_s2] sm:$0x7] (!%p138_p2) }
   0x7   : > { %225 = vperm.xlu0 (!%p138_p2), %445, %v222_v3  }
   0x8   : > { %383 = vmatprep.mubr.msk.f32.mxu0 (!%p138_p2), %vm230_vm0, %v229_v1 }
   0xd   : > { %s569_s13 = smov (!%p161_p3, %s373_s13), 1 }
   0xe   : > { %s435_s18 = smul.u32 400, %s569_s13  ;;  %s386_s22 = sshll.u32 %s569_s13, 3 }
   0xf   : > { %s170_s25 = scalar_lea.vmem %s567_s3, %s386_s22 }
  0x10   : > { %s504_s21 = scalar_lea.vmem %s564_s0, %s435_s18 }
  0x11   : > { %v173_v4 = vld [vmem:[%s504_s21 + $0x8] sm:$0xff]  ;;  %v175_v5 = vld [vmem:[%s504_s21 + $0x18] sm:$0xff]  ;;  %v172_v6 = vld [vmem:[%s504_s21] sm:$0xff] }
  0x12   : > { %v387_v7 = vpack.c.bf16 %v175_v5, %v173_v4  ;;  %v174_v8 = vld [vmem:[%s504_s21 + $0x10] sm:$0xff]  ;;  %v177_v9 = vld [vmem:[%s504_s21 + $0x28] sm:$0xff]  ;;  %v179_v10 = vld [vmem:[%s504_s21 + $0x38] sm:$0xff] }
  0x13   : > { %v389_v11 = vpack.c.bf16 %v174_v8, %v172_v6  ;;  %v391_v12 = vpack.c.bf16 %v179_v10, %v177_v9  ;;  %v176_v13 = vld [vmem:[%s504_s21 + $0x20] sm:$0xff]  ;;  %v178_v14 = vld [vmem:[%s504_s21 + $0x30] sm:$0xff]  ;;  %v181_v15 = vld [vmem:[%s504_s21 + $0x48] sm:$0xff] }
  0x14   : > { %388 = vmatprep.subr.bf16.mxu0 %v387_v7  ;;  %v183_v16 = vld [vmem:[%s504_s21 + $0x58] sm:$0xff]  ;;  %v393_v17 = vpack.c.bf16 %v178_v14, %v176_v13  ;;  %v180_v19 = vld [vmem:[%s504_s21 + $0x40] sm:$0xff]  ;;  %v182_v20 = vld [vmem:[%s504_s21 + $0x50] sm:$0xff] }
  0x15   : > { %390 = vmatpush1.bf16.msra.mxu0 %v389_v11  ;;  %v395_v18 = vpack.c.bf16 %v183_v16, %v181_v15  ;;  %v185_v21 = vld [vmem:[%s504_s21 + $0x68] sm:$0xff]  ;;  %v187_v22 = vld [vmem:[%s504_s21 + $0x78] sm:$0xff]  ;;  %v397_v23 = vpack.c.bf16 %v182_v20, %v180_v19  ;;  %v184_v25 = vld [vmem:[%s504_s21 + $0x60] sm:$0xff] }
  0x16   : > { %392 = vmatprep.subr.bf16.mxu0 %v391_v12  ;;  %v399_v24 = vpack.c.bf16 %v187_v22, %v185_v21  ;;  %v186_v26 = vld [vmem:[%s504_s21 + $0x70] sm:$0xff]  ;;  %v189_v27 = vld [vmem:[%s504_s21 + $0x88] sm:$0xff]  ;;  %v191_v28 = vld [vmem:[%s504_s21 + $0x98] sm:$0xff] }
  0x17   : > { %v401_v29 = vpack.c.bf16 %v186_v26, %v184_v25  ;;  %v403_v30 = vpack.c.bf16 %v191_v28, %v189_v27  ;;  %v188_v31 = vld [vmem:[%s504_s21 + $0x80] sm:$0xff]  ;;  %v190_v32 = vld [vmem:[%s504_s21 + $0x90] sm:$0xff]  ;;  %v193_v33 = vld [vmem:[%s504_s21 + $0xa8] sm:$0xff] }
  0x18   : > { %v195_v34 = vld [vmem:[%s504_s21 + $0xb8] sm:$0xff]  ;;  %v405_v35 = vpack.c.bf16 %v190_v32, %v188_v31  ;;  %v192_v37 = vld [vmem:[%s504_s21 + $0xa0] sm:$0xff]  ;;  %v194_v38 = vld [vmem:[%s504_s21 + $0xb0] sm:$0xff] }
  0x19   : > { %394 = vmatpush1.bf16.msra.mxu0 %v393_v17  ;;  %v407_v36 = vpack.c.bf16 %v195_v34, %v193_v33  ;;  %v197_v39 = vld [vmem:[%s504_s21 + $0xc8] sm:$0xff]  ;;  %v199_v40 = vld [vmem:[%s504_s21 + $0xd8] sm:$0xff]  ;;  %v409_v41 = vpack.c.bf16 %v194_v38, %v192_v37  ;;  %v196_v43 = vld [vmem:[%s504_s21 + $0xc0] sm:$0xff] }
  0x1a   : > { %396 = vmatprep.subr.bf16.mxu0 %v395_v18  ;;  %v411_v42 = vpack.c.bf16 %v199_v40, %v197_v39  ;;  %v198_v44 = vld [vmem:[%s504_s21 + $0xd0] sm:$0xff]  ;;  %v201_v45 = vld [vmem:[%s504_s21 + $0xe8] sm:$0xff]  ;;  %v203_v46 = vld [vmem:[%s504_s21 + $0xf8] sm:$0xff] }
  0x1b   : > { %v413_v47 = vpack.c.bf16 %v198_v44, %v196_v43  ;;  %v415_v48 = vpack.c.bf16 %v203_v46, %v201_v45  ;;  %v200_v49 = vld [vmem:[%s504_s21 + $0xe0] sm:$0xff]  ;;  %v202_v50 = vld [vmem:[%s504_s21 + $0xf0] sm:$0xff]  ;;  %v205_v51 = vld [vmem:[%s504_s21 + $0x108] sm:$0xff] }
  0x1c   : > { %v207_v52 = vld [vmem:[%s504_s21 + $0x118] sm:$0xff]  ;;  %v417_v53 = vpack.c.bf16 %v202_v50, %v200_v49  ;;  %v204_v55 = vld [vmem:[%s504_s21 + $0x100] sm:$0xff]  ;;  %v206_v56 = vld [vmem:[%s504_s21 + $0x110] sm:$0xff] }
  0x1d   : > { %398 = vmatpush1.bf16.msra.mxu0 %v397_v23  ;;  %v419_v54 = vpack.c.bf16 %v207_v52, %v205_v51  ;;  %v209_v57 = vld [vmem:[%s504_s21 + $0x128] sm:$0xff]  ;;  %v211_v58 = vld [vmem:[%s504_s21 + $0x138] sm:$0xff]  ;;  %v421_v59 = vpack.c.bf16 %v206_v56, %v204_v55  ;;  %v208_v61 = vld [vmem:[%s504_s21 + $0x120] sm:$0xff] }
  0x1e   : > { %400 = vmatprep.subr.bf16.mxu0 %v399_v24  ;;  %v423_v60 = vpack.c.bf16 %v211_v58, %v209_v57  ;;  %v210_v62 = vld [vmem:[%s504_s21 + $0x130] sm:$0xff]  ;;  %v213_v63 = vld [vmem:[%s504_s21 + $0x148] sm:$0xff]  ;;  %v215_v1 = vld [vmem:[%s504_s21 + $0x158] sm:$0xff] }
  0x1f   : > { %v425_v2 = vpack.c.bf16 %v210_v62, %v208_v61  ;;  %v427_v3 = vpack.c.bf16 %v215_v1, %v213_v63  ;;  %v212_v4 = vld [vmem:[%s504_s21 + $0x140] sm:$0xff]  ;;  %v214_v5 = vld [vmem:[%s504_s21 + $0x150] sm:$0xff]  ;;  %v217_v6 = vld [vmem:[%s504_s21 + $0x168] sm:$0xff] }
  0x20   : > { %v219_v7 = vld [vmem:[%s504_s21 + $0x178] sm:$0xff]  ;;  %v429_v8 = vpack.c.bf16 %v214_v5, %v212_v4  ;;  %v216_v10 = vld [vmem:[%s504_s21 + $0x160] sm:$0xff]  ;;  %v218_v11 = vld [vmem:[%s504_s21 + $0x170] sm:$0xff] }
  0x21   : > { %402 = vmatpush1.bf16.msra.mxu0 %v401_v29  ;;  %v431_v9 = vpack.c.bf16 %v219_v7, %v217_v6  ;;  %v433_v12 = vpack.c.bf16 %v218_v11, %v216_v10  ;;  %v221_v13 = vld [vmem:[%s504_s21 + $0x188] sm:$0xf]  ;;  %v220_v14 = vld [vmem:[%s504_s21 + $0x180] sm:$0xf] }
  0x22   : > { %404 = vmatprep.subr.bf16.mxu0 %v403_v30 }
  0x25   : > { %406 = vmatpush1.bf16.msra.mxu0 %v405_v35 }
  0x26   : > { %408 = vmatprep.subr.bf16.mxu0 %v407_v36 }
  0x29   : > { %410 = vmatpush1.bf16.msra.mxu0 %v409_v41 }
  0x2a   : > { %412 = vmatprep.subr.bf16.mxu0 %v411_v42 }
  0x2d   : > { %414 = vmatpush1.bf16.msra.mxu0 %v413_v47 }
  0x2e   : > { %416 = vmatprep.subr.bf16.mxu0 %v415_v48 }
  0x31   : > { %418 = vmatpush1.bf16.msra.mxu0 %v417_v53 }
  0x32   : > { %420 = vmatprep.subr.bf16.mxu0 %v419_v54 }
  0x35   : > { %422 = vmatpush1.bf16.msra.mxu0 %v421_v59 }
  0x36   : > { %424 = vmatprep.subr.bf16.mxu0 %v423_v60 }
  0x39   : > { %426 = vmatpush1.bf16.msra.mxu0 %v425_v2 }
  0x3a   : > { %428 = vmatprep.subr.bf16.mxu0 %v427_v3 }
  0x3d   : > { %430 = vmatpush1.bf16.msra.mxu0 %v429_v8 }
  0x3e   : > { %432 = vmatprep.subr.bf16.mxu0 %v431_v9 }
  0x41   : > { %434 = vmatpush1.bf16.msra.mxu0 %v433_v12 }
  0x42   : > { %381 = vmatprep.subr.msk.mxu0 %vm233_vm1, %v221_v13 }
  0x45   : > { %382 = vmatpush1.msk.msra.mxu0 %vm233_vm1, %v220_v14 }
  0x46   : > { %305 = vmatmul.mubr.f32.vlgmr.msra.gmra.mrb[0].mxu0 %v491_v0 }
  0x86   : > { %v226_v15 = vpop.permute.xlu0 %225 }
 0x119   : > { %v306_v16 = vpop.f32.mrb[0].mxu0 }
 0x11a   : > { %v307_v17 = vadd.f32 %v306_v16, %v226_v15  ;;  %v308_v18 = vpop.f32.mrb[1].mxu0 }
 0x11b   : > { %v309_v19 = vadd.f32 %v308_v18, %v226_v15 }
 0x11c   : > { %447 = vtanh.f32 %v307_v17 }
 0x11d   : > { %449 = vtanh.f32 %v309_v19 }
 0x126   : > { %v448_v20 = vpop.eup %447 }
 0x127   : > { %v450_v21 = vpop.eup %449 }
 0x128   : > { %v315_v22 = vcombine.low %v448_v20, %v450_v21 }
 0x12a   : > { %317 = vst [vmem:[%s170_s25] sm:$0x77] %v315_v22 }
 0x12b PF: > { %s13_s12 = sadd.s32 1, %s457_s12  }
 0x12c   : > { %p10_p4 = scmp.ge.s32.totalorder %s13_s12, 4  }
 0x12e   :  { %12 = sbr.rel (!%p10_p4) target bundleno = 1 (0x1), region = 62 }

</bundles_post_ra>
